<compile_context>
chip_gen: v6e
topology: v6e:2x2x1
jax: 0.10.0
libtpu: 0.0.40
codegen_flags: <defaults>
</compile_context>

<pallas_src>
import jax
import jax.numpy as jnp
from jax.experimental import pallas as pl
from jax.experimental.pallas import tpu as pltpu

_BN_EPS = 1e-5
_MAX_ROW_TILE = 512     # per-step overhead amortization; ~85% of HBM roofline
_M_ALIGN = 16           # bf16-friendly sublane alignment for the row dim
_VMEM_LIMIT = 32 * 1024 * 1024  # <= half of v7x's 64 MiB physical VMEM


def _round_up(v, m):
    return (v + m - 1) // m * m


# ----------------------------------------------------------------------------
# Pallas kernels
# ----------------------------------------------------------------------------
def _make_mm_kernel(apply_relu, has_residual):
    """y = relu?( (x @ w) + bias (+ residual) )   (scale already folded into w)"""
    def kernel(x_ref, w_ref, b_ref, *rest):
        if has_residual:
            res_ref, o_ref = rest
        else:
            (o_ref,) = rest
        acc = jnp.dot(x_ref[...], w_ref[...], preferred_element_type=jnp.float32)
        y = acc + b_ref[...]
        if has_residual:
            y = y + res_ref[...].astype(jnp.float32)
        if apply_relu:
            y = jnp.maximum(y, 0.0)
        o_ref[...] = y.astype(o_ref.dtype)
    return kernel


def _maxpool_kernel(*refs):
    # refs = 9 shifted (tm, C) tap views + output; running elementwise max (VPU).
    o_ref = refs[-1]
    m = refs[0][...]
    for r in refs[1:-1]:
        m = jnp.maximum(m, r[...])
    o_ref[...] = m


def _avgpool_kernel(x_ref, o_ref):
    # x_ref: (N, H*W, C) -> global spatial mean (f32 accumulate)
    o_ref[...] = jnp.mean(x_ref[...].astype(jnp.float32), axis=1)


# ----------------------------------------------------------------------------
# Pallas wrappers
# ----------------------------------------------------------------------------
def fused_matmul(x, w, bias, residual=None, relu=True,
                 out_dtype=jnp.bfloat16, max_tm=_MAX_ROW_TILE):
    """x:(M,K) @ w:(K,N) + bias (+residual) (+relu), tiled over M, bf16 MXU."""
    M, K = x.shape
    K2, N = w.shape
    assert K == K2
    # Lane-dense contraction dim (multiple of 128). Callers that build im2col
    # matrices pre-pad K so this branch only triggers for the tiny fc/dense.
    Kp = _round_up(K, 128)
    if Kp != K:
        x = jnp.pad(x, ((0, 0), (0, Kp - K)))
        w = jnp.pad(w, ((0, Kp - K), (0, 0)))
    Mp = _round_up(M, _M_ALIGN)
    if Mp != M:
        x = jnp.pad(x, ((0, Mp - M), (0, 0)))
        if residual is not None:
            residual = jnp.pad(residual, ((0, Mp - M), (0, 0)))

    tm = min(max_tm, Mp)
    grid = (pl.cdiv(Mp, tm),)

    x = x.astype(jnp.bfloat16)
    w = w.astype(jnp.bfloat16)
    bias2 = bias.reshape(1, N).astype(jnp.float32)

    in_specs = [
        pl.BlockSpec((tm, Kp), lambda i: (i, 0)),
        pl.BlockSpec((Kp, N), lambda i: (0, 0)),     # grid-invariant weight
        pl.BlockSpec((1, N), lambda i: (0, 0)),      # grid-invariant bias
    ]
    args = [x, w, bias2]
    if residual is not None:
        residual = residual.astype(jnp.bfloat16)
        in_specs.append(pl.BlockSpec((tm, N), lambda i: (i, 0)))
        args.append(residual)

    out = pl.pallas_call(
        _make_mm_kernel(relu, residual is not None),
        out_shape=jax.ShapeDtypeStruct((Mp, N), out_dtype),
        grid=grid,
        in_specs=in_specs,
        out_specs=pl.BlockSpec((tm, N), lambda i: (i, 0)),
        compiler_params=pltpu.CompilerParams(
            dimension_semantics=("parallel",),
            vmem_limit_bytes=_VMEM_LIMIT,
        ),
    )(*args)
    return out[:M] if Mp != M else out


def conv_bn(x, w_oihw, scale, bias, stride, padding, relu, residual=None):
    """Conv2d (no bias) + folded BN (+residual) (+ReLU) via im2col + fused matmul."""
    N, H, W, Cin = x.shape
    Cout, _, kh, kw = w_oihw.shape
    Ho = (H + 2 * padding - kh) // stride + 1
    Wo = (W + 2 * padding - kw) // stride + 1
    M = N * Ho * Wo
    K = kh * kw * Cin
    Kp = _round_up(K, 128)

    xp = jnp.pad(x, ((0, 0), (padding, padding), (padding, padding), (0, 0)))
    pats = [xp[:, ki:ki + stride * Ho:stride, kj:kj + stride * Wo:stride, :]
            for ki in range(kh) for kj in range(kw)]
    if Kp != K:
        # Build the K padding directly into the single concatenate (no extra copy).
        pats.append(jnp.zeros((N, Ho, Wo, Kp - K), x.dtype))
    A = jnp.concatenate(pats, axis=-1).reshape(M, Kp)

    # Fold the BN scale into the weight columns: W' = W * scale[out].
    w_scaled = w_oihw * scale.reshape(Cout, 1, 1, 1)
    Wm = jnp.transpose(w_scaled, (2, 3, 1, 0)).reshape(K, Cout)
    if Kp != K:
        Wm = jnp.pad(Wm, ((0, Kp - K), (0, 0)))

    res2d = residual.reshape(M, Cout) if residual is not None else None
    out = fused_matmul(A, Wm, bias, residual=res2d, relu=relu)
    return out.reshape(N, Ho, Wo, Cout)


def maxpool_3x3_s2_p1(x):
    N, H, W, C = x.shape
    Ho = (H + 2 - 3) // 2 + 1
    Wo = (W + 2 - 3) // 2 + 1
    M = N * Ho * Wo
    xp = jnp.pad(x, ((0, 0), (1, 1), (1, 1), (0, 0)),
                 constant_values=-jnp.inf)
    # 9 shifted strided views fed as separate lane-dense (tm, C) inputs;
    # the kernel takes a running max (no (M, 9, C) stacked tensor in HBM).
    taps = [xp[:, ki:ki + 2 * Ho:2, kj:kj + 2 * Wo:2, :].reshape(M, C)
            for ki in range(3) for kj in range(3)]
    Mp = _round_up(M, _M_ALIGN)
    if Mp != M:
        taps = [jnp.pad(t, ((0, Mp - M), (0, 0))) for t in taps]
    tm = min(_MAX_ROW_TILE, Mp)
    out = pl.pallas_call(
        _maxpool_kernel,
        out_shape=jax.ShapeDtypeStruct((Mp, C), x.dtype),
        grid=(pl.cdiv(Mp, tm),),
        in_specs=[pl.BlockSpec((tm, C), lambda i: (i, 0)) for _ in taps],
        out_specs=pl.BlockSpec((tm, C), lambda i: (i, 0)),
        compiler_params=pltpu.CompilerParams(
            dimension_semantics=("parallel",),
            vmem_limit_bytes=_VMEM_LIMIT,
        ),
    )(*taps)
    return out[:M].reshape(N, Ho, Wo, C)


def global_avgpool(x):
    N, H, W, C = x.shape
    xr = x.reshape(N, H * W, C)
    return pl.pallas_call(
        _avgpool_kernel,
        out_shape=jax.ShapeDtypeStruct((N, C), jnp.float32),
        grid=(1,),
        in_specs=[pl.BlockSpec((N, H * W, C), lambda i: (0, 0, 0))],
        out_specs=pl.BlockSpec((N, C), lambda i: (0, 0)),
    )(xr)


def linear(x, w_torch, b, relu, out_dtype=jnp.float32):
    # w_torch follows PyTorch (out_features, in_features) convention.
    return fused_matmul(x, jnp.transpose(w_torch), b, relu=relu, out_dtype=out_dtype)


# ----------------------------------------------------------------------------
# Parameter init (synthetic, deterministic)
# ----------------------------------------------------------------------------
# TODO(synk): original module loads ResNet18 IMAGENET1K_V1 pretrained weights
# (and its preprocess transforms); here parameters are synthesized
# deterministically with the same shapes/architecture.
def _init_conv(key, cin, cout, k):
    std = (2.0 / (cin * k * k)) ** 0.5
    return jax.random.normal(key, (cout, cin, k, k), jnp.float32) * std


def _init_bn(key, c):
    k1, k2, k3, k4 = jax.random.split(key, 4)
    gamma = 1.0 + 0.1 * jax.random.normal(k1, (c,), jnp.float32)
    beta = 0.1 * jax.random.normal(k2, (c,), jnp.float32)
    mean = 0.1 * jax.random.normal(k3, (c,), jnp.float32)
    var = 1.0 + 0.1 * jax.random.uniform(k4, (c,), jnp.float32)
    return gamma, beta, mean, var


def _fold_bn(gamma, beta, mean, var):
    scale = gamma / jnp.sqrt(var + _BN_EPS)
    bias = beta - mean * scale
    return scale, bias


def _init_block(key, cin, cout, stride):
    ks = jax.random.split(key, 6)
    p = {
        'stride': stride,
        'conv1_w': _init_conv(ks[0], cin, cout, 3),
        'bn1': _fold_bn(*_init_bn(ks[1], cout)),
        'conv2_w': _init_conv(ks[2], cout, cout, 3),
        'bn2': _fold_bn(*_init_bn(ks[3], cout)),
    }
    if stride != 1 or cin != cout:
        p['down_w'] = _init_conv(ks[4], cin, cout, 1)
        p['down_bn'] = _fold_bn(*_init_bn(ks[5], cout))
    return p


def init_params(key):
    keys = jax.random.split(key, 16)
    params = {
        'conv1_w': _init_conv(keys[0], 3, 64, 7),
        'bn1': _fold_bn(*_init_bn(keys[1], 64)),
    }
    layer_cfg = [(64, 64, 1), (64, 128, 2), (128, 256, 2), (256, 512, 2)]
    layers = []
    kidx = 2
    for cin, cout, stride in layer_cfg:
        blocks = [_init_block(keys[kidx], cin, cout, stride),
                  _init_block(keys[kidx + 1], cout, cout, 1)]
        kidx += 2
        layers.append(blocks)
    params['layers'] = layers
    params['fc_w'] = jax.random.normal(keys[kidx], (1000, 512), jnp.float32) / (512.0 ** 0.5)
    params['fc_b'] = 0.01 * jax.random.normal(keys[kidx + 1], (1000,), jnp.float32)
    params['dense_w'] = jax.random.normal(keys[kidx + 2], (4, 1000), jnp.float32) / (1000.0 ** 0.5)
    params['dense_b'] = 0.01 * jax.random.normal(keys[kidx + 3], (4,), jnp.float32)
    return params


# ----------------------------------------------------------------------------
# Forward pass (mirrors torch Conv.forward)
# ----------------------------------------------------------------------------
def basic_block(x, p):
    stride = p['stride']
    identity = x
    s1, b1 = p['bn1']
    out = conv_bn(x, p['conv1_w'], s1, b1, stride=stride, padding=1, relu=True)
    if 'down_w' in p:
        sd, bd = p['down_bn']
        identity = conv_bn(x, p['down_w'], sd, bd, stride=stride, padding=0, relu=False)
    s2, b2 = p['bn2']
    # fused: relu(bn2(conv2(out)) + identity)
    out = conv_bn(out, p['conv2_w'], s2, b2, stride=1, padding=1,
                  relu=True, residual=identity)
    return out


def resnet_forward(x_nchw, params):
    x = jnp.transpose(x_nchw, (0, 2, 3, 1)).astype(jnp.bfloat16)  # NCHW -> NHWC bf16
    s, b = params['bn1']
    x = conv_bn(x, params['conv1_w'], s, b, stride=2, padding=3, relu=True)
    x = maxpool_3x3_s2_p1(x)
    for layer in params['layers']:
        for blk in layer:
            x = basic_block(x, blk)
    x = global_avgpool(x)                          # (N, 512) f32 == flatten(avgpool)
    # Spec order: fc -> ReLU -> dense (the torch module applies self.relu after fc).
    x = linear(x, params['fc_w'], params['fc_b'], relu=True, out_dtype=jnp.float32)
    x = linear(x, params['dense_w'], params['dense_b'], relu=False, out_dtype=jnp.float32)
    return x


if __name__ == "__main__":
    key = jax.random.PRNGKey(0)
    pkey, xkey = jax.random.split(key)
    params = init_params(pkey)
    # PyTorch-convention NCHW input; small spatial size (64x64) for the demo.
    x = jax.random.normal(xkey, (2, 3, 64, 64), jnp.float32)
    out = resnet_forward(x, params)
    out = jax.block_until_ready(out)
    assert out.shape == (2, 4) and out.dtype == jnp.float32
    print("KERNEL_OK")
</pallas_src>

<mosaic_0001>
module attributes {stable_mosaic.version = 11 : i64} {
  func.func @kernel(%arg0: i32, %arg1: memref<512x256xbf16, #tpu.memory_space<vmem>>, %arg2: memref<256x64xbf16, #tpu.memory_space<vmem>>, %arg3: memref<1x64xf32, #tpu.memory_space<vmem>>, %arg4: memref<512x64xbf16, #tpu.memory_space<vmem>>) attributes {dimension_semantics = [#tpu.dimension_semantics<parallel>], iteration_bounds = array<i64: 4>, scalar_prefetch = 0 : i64, scratch_operands = 0 : i64, tpu.core_type = #tpu.core_type<tc>, window_params = [{transform_indices = @transform_0, window_bounds = array<i64: 512, 256>}, {pipeline_mode = #tpu.pipeline_mode<synchronous>, transform_indices = @transform_1, window_bounds = array<i64: 256, 64>}, {pipeline_mode = #tpu.pipeline_mode<synchronous>, transform_indices = @transform_2, window_bounds = array<i64: 1, 64>}, {transform_indices = @transform_3, window_bounds = array<i64: 512, 64>}]} {
    %c0 = arith.constant 0 : index
    %c0_0 = arith.constant 0 : index
    %0 = vector.load %arg1[%c0, %c0_0] : memref<512x256xbf16, #tpu.memory_space<vmem>>, vector<512x256xbf16>
    %c0_1 = arith.constant 0 : index
    %c0_2 = arith.constant 0 : index
    %1 = vector.load %arg2[%c0_1, %c0_2] : memref<256x64xbf16, #tpu.memory_space<vmem>>, vector<256x64xbf16>
    %cst = arith.constant dense<0.000000e+00> : vector<512x64xf32>
    %2 = tpu.matmul %0, %1, %cst {dimension_numbers = #tpu.dot_dimension_numbers<[1], [0], [0], [1], [0, 0, 1, 1], [], []>} : vector<512x256xbf16>, vector<256x64xbf16>, vector<512x64xf32> -> vector<512x64xf32>
    %c0_3 = arith.constant 0 : index
    %c0_4 = arith.constant 0 : index
    %3 = vector.load %arg3[%c0_3, %c0_4] : memref<1x64xf32, #tpu.memory_space<vmem>>, vector<1x64xf32>
    %4 = vector.broadcast %3 : vector<1x64xf32> to vector<512x64xf32>
    %5 = arith.addf %2, %4 : vector<512x64xf32>
    %cst_5 = arith.constant 0.000000e+00 : f32
    %6 = vector.broadcast %cst_5 : f32 to vector<512x64xf32>
    %7 = arith.maximumf %5, %6 : vector<512x64xf32>
    %8 = arith.truncf %7 : vector<512x64xf32> to vector<512x64xbf16>
    %c0_6 = arith.constant 0 : index
    %c0_7 = arith.constant 0 : index
    %9 = vector.load %arg4[%c0_6, %c0_7] : memref<512x64xbf16, #tpu.memory_space<vmem>>, vector<512x64xbf16>
    tpu.vector_store %arg4[%c0_6, %c0_7], %8 {strides = array<i32>} : memref<512x64xbf16, #tpu.memory_space<vmem>>, vector<512x64xbf16>,
    return
  }
  func.func @transform_0(%arg0: i32) -> (i32, i32) {
    %c0_i32 = arith.constant 0 : i32
    %c0_i32_0 = arith.constant 0 : i32
    return %arg0, %c0_i32 : i32, i32
  }
  func.func @transform_1(%arg0: i32) -> (i32, i32) {
    %c0_i32 = arith.constant 0 : i32
    %c0_i32_0 = arith.constant 0 : i32
    %c0_i32_1 = arith.constant 0 : i32
    return %c0_i32, %c0_i32_0 : i32, i32
  }
  func.func @transform_2(%arg0: i32) -> (i32, i32) {
    %c0_i32 = arith.constant 0 : i32
    %c0_i32_0 = arith.constant 0 : i32
    %c0_i32_1 = arith.constant 0 : i32
    return %c0_i32, %c0_i32_0 : i32, i32
  }
  func.func @transform_3(%arg0: i32) -> (i32, i32) {
    %c0_i32 = arith.constant 0 : i32
    %c0_i32_0 = arith.constant 0 : i32
    return %arg0, %c0_i32 : i32, i32
  }
}

</mosaic_0001>

<bundles_post_ra>
// kernel: tpu_custom_call.1
= control target key start
LH: loop header
LB: loop body
LE: loop exit
PB: predicated region body
PF: predicated region fallthrough
CT: control target
= control target key end

     0   :  { %8 = vsyncpa [#allocation3], 0  ;;  %s2399_s0 = inlined_call_operand.hbm [shape: bf16[2048,256], index: 0, kind: input, shape index: {}]   ;;  %s2400_s1 = inlined_call_operand.vmem [shape: bf16[256,64], index: 1, kind: input, shape index: {}]   ;;  %s2401_s2 = inlined_call_operand.vmem [shape: f32[1,64], index: 2, kind: input, shape index: {}]   ;;  %s2402_s3 = inlined_call_operand.vmem [shape: bf16[2048,64], index: 3, kind: output, shape index: {}]  }
   0x1   :  { %10 = vsyncpa [#allocation3 + $0x1], 0  ;;  %s1954_s12 = smov 0   ;;  %s1956_s13 = smov 0  }
   0x2   :  { %s1958_s14 = smov 0   ;;  %s1960_s15 = smov 0  }
   0x3 LB: > { %s1455_s16 = sadd.s32 4294967295, %s1928_s15   ;;  %s1974_s17 = sadd.s32 1, %s1928_s15   ;;  %s1928_s15 = sphi %s1960_s15, %s2411_s15   ;;  %s1924_s14 = sphi %s1958_s14, %s2410_s14   ;;  %s1920_s13 = sphi %s1956_s13, %s2409_s13   ;;  %s1916_s12 = sphi %s1954_s12, %s2408_s12  }
   0x4   : > { %s20_s18 = ssub.s32 %s1928_s15, %s1974_s17  ;;  %s23_s19 = sadd.s32 1, %s1924_s14 }
   0x5   : > { %p21_p0 = scmp.eq.s32.totalorder %s20_s18, 0  ;;  %p30_p1 = scmp.ne.s32.totalorder %s1924_s14, %s1920_s13 }
   0x6   : > { %p31_p2 = scmp.eq.s32.totalorder %s1928_s15, 0  ;;  %p36_p3 = scmp.ne.s32.totalorder %s1920_s13, %s1916_s12 }
   0x7   : > { %s1984_s20 = scalar_select %p21_p0, %s1924_s14, %s23_s19  }
   0x8   : > { %p32_p4 = por %p31_p2, %p30_p1  ;;  %p37_p5 = scmp.eq.s32.totalorder %s1455_s16, 0 }
   0x9   : > { %p1718_p6 = scmp.lt.s32.totalorder %s1928_s15, 4  ;;  %s134_s22 = sand.u32 1, %s1924_s14  }
   0xa   : > { %p1989_p7 = por %p37_p5, %p36_p3  ;;  %s1459_s23 = sshll.u32 %s134_s22, 9 }
   0xb   : > { %s1615_s24 = sshll.u32 %s1928_s15, 13  ;;  %s138_s28 = scalar_lea.vmem [#allocation2], %s1459_s23 }
   0xc   : > { %s2404_s21 = scalar_select %p1989_p7, 1, 0 }
   0xd   : > { %s1998_s27 = scalar_lea.hbm %s2399_s0, %s1615_s24  ;;  %s146_s29 = sshll.u32 %s138_s28, 4  ;;  %s2000_s29 = int_to_ptr.vmem [resolvable:$true] %s146_s29 }
   0xe   : > { %p2002_p8 = pnand %p1718_p6, %p32_p4  ;;  %s2007_s4 = scalar_lea.sflag [#allocation3], %s134_s22 }
   0xf   : > { %s1866_s5 = scalar_lea.hbm %s1998_s27, 8192  ;;  %s1871_s8 = scalar_lea.hbm %s2399_s0, 32768 }
  0x10   : > { %p1867_p10 = scmp.ne.s32.totalorder %s1998_s27, %s1866_s5  ;;  %p1868_p11 = pneg %p2002_p8 }
  0x11   : > { %p1872_p0 = scmp.lt.s32.totalorder %s1998_s27, %s2399_s0  ;;  %p1873_p1 = scmp.lt.s32.totalorder %s1871_s8, %s1866_s5 }
  0x12   : > { %p1869_p12 = pnand %p1868_p11, %p1867_p10 }
  0x13   : > { %p1874_p2 = por %p1873_p1, %p1872_p0 }
  0x14   : > { %p1870_p13 = pneg %p1869_p12 }
  0x16   : > { %p1875_p3 = pnand %p1874_p2, %p1870_p13 }
  0x18   : > { %1878 = shalt.err (!%p1875_p3)
}
  0x19   : > { %s1879_s11 = scalar_lea.vmem %s2000_s29, 8192  ;;  %s1930_s12 = smov [#allocation2]  }
  0x1a   : > { %p1880_p4 = scmp.ne.s32.totalorder %s2000_s29, %s1879_s11  ;;  %s1884_s18 = sshll.u32 %s1930_s12, 4  ;;  %s1885_s18 = int_to_ptr.vmem [resolvable:$false] %s1884_s18 }
  0x1b   : > { %s1886_s19 = scalar_lea.vmem %s1885_s18, 16384  ;;  %p1887_p10 = scmp.lt.s32.totalorder %s2000_s29, %s1885_s18 }
  0x1c   : > { %p1882_p5 = pnand %p1880_p4, %p1868_p11  ;;  %p1888_p12 = scmp.lt.s32.totalorder %s1886_s19, %s1879_s11 }
  0x1e   : > { %p1883_p6 = pneg %p1882_p5  ;;  %p1889_p9 = por %p1888_p12, %p1887_p10 }
  0x20   : > { %p1890_p7 = pnand %p1889_p9, %p1883_p6 }
  0x22   : > { %1893 = shalt.err (!%p1890_p7)
}
  0x23   : > { %s1931_s22 = smov 128   ;;  %s1932_s23 = smov 8  }
  0x24   : > { %1717 = dma.hbm_to_vmem [thread:$0]  (!%p2002_p8), %s1998_s27, 8192, %s2000_s29, %s2007_s4, %s1931_s22, %s1931_s22, %s1932_s23  }
  0x25   : > { %p154_p11 = scmp.lt.s32.totalorder %s1928_s15, 5  ;;  %p2406_p13 = scmp.ge.s32.totalorder %s1928_s15, 1 }
  0x27   : > { %p155_p0 = pnand %p2406_p13, %p154_p11 }
  0x28   : > { %s160_s24 = sand.u32 (!%p155_p0), 1, %s1920_s13   ;;  %p2407_p7 = scmp.ne.s32.totalorder (!%p155_p0), %s2404_s21, 0 }
  0x29   : > { %158 = sbr.rel (%p155_p0) target bundleno = 436 (0x1b4), region = 32  ;;  %s1464_s25 = sshll.u32 (!%p155_p0), %s160_s24, 9 }
  0x2a   : > { %s161_s26 = scalar_lea.sflag (!%p155_p0), [#allocation3], %s160_s24  ;;  %s2032_s28 = scalar_lea.vmem (!%p155_p0), [#allocation2], %s1464_s25 }
  0x2e   : > { %1911 = dma.done.wait (%p2407_p7), %s161_s26, 8192  }
  0x2f   : > { %1913 = vsyncadd (%p2407_p7), %s161_s26, 4294959104  ;;  %v1933_v0 = vmov 0   ;;  %v1754_v1 = vld [vmem:[%s2400_s1 + $0x38] sm:$0xff]   ;;  %v1755_v2 = vld [vmem:[%s2400_s1 + $0x30] sm:$0xff]   ;;  %s1465_s12 = sshll.u32 %s1455_s16, 6  ;;  %vm1323_vm0 = vcmask 519168  }
  0x30   : > { %714 = vmatprep.subr.bf16.mxu0 %v1933_v0  ;;  %1680 = vmatprep.subr.bf16.mxu1 %v1933_v0  ;;  %v1756_v3 = vld [vmem:[%s2400_s1 + $0x28] sm:$0xff]   ;;  %v1757_v4 = vld [vmem:[%s2400_s1 + $0x20] sm:$0xff]   ;;  %v1758_v5 = vld [vmem:[%s2400_s1 + $0x18] sm:$0xff]   ;;  %p189_p8 = scmp.lt.s32.totalorder %s1465_s12, 255 }
  0x31   : > { %715 = vmatpush1.bf16.msra.mxu0 %v1754_v1  ;;  %1696 = vmatpush1.bf16.msra.mxu1 %v1754_v1  ;;  %v1772_v6 = vld [vmem:[%s2032_s28 + $0x4] ss:$8 sps:$4 sm:$0xff]   ;;  %v1759_v7 = vld [vmem:[%s2400_s1 + $0x10] sm:$0xff]   ;;  %v1762_v11 = vld [vmem:[%s2400_s1 + $0x78] sm:$0xff]  }
  0x32   : > { %716 = vmatprep.subr.bf16.mxu0 %v1933_v0  ;;  %1681 = vmatprep.subr.bf16.mxu1 %v1933_v0  ;;  %v1775_v8 = vld [vmem:[%s2032_s28 + $0x104] ss:$8 sps:$4 sm:$0xff]   ;;  %v1763_v12 = vld [vmem:[%s2400_s1 + $0x70] sm:$0xff]   ;;  %v1766_v15 = vld [vmem:[%s2400_s1 + $0x58] sm:$0xff]   ;;  %s2413_s12 = smov (!%p189_p8, %s1465_s12), 255 }
  0x33   : > { %746 = vmatprep.mubr.bf16.mxu0 %v1772_v6  ;;  %874 = vmatprep.mubr.bf16.mxu1 %v1775_v8  ;;  %v1760_v9 = vld [vmem:[%s2400_s1 + $0x8] sm:$0xff]   ;;  %v1761_v10 = vld [vmem:[%s2400_s1] sm:$0xff]   ;;  %v1767_v16 = vld [vmem:[%s2400_s1 + $0x50] sm:$0xff]   ;;  %s1466_s22 = sshll.u32 %s2413_s12, 2 }
  0x34   : > { %v1764_v13 = vld [vmem:[%s2400_s1 + $0x68] sm:$0xff]   ;;  %v1765_v14 = vld [vmem:[%s2400_s1 + $0x60] sm:$0xff]   ;;  %v1776_v21 = vld [vmem:[%s2032_s28 + $0x14] ss:$8 sps:$4 sm:$0xff]  }
  0x35   : > { %717 = vmatpush1.bf16.msra.mxu0 %v1755_v2  ;;  %1697 = vmatpush1.bf16.msra.mxu1 %v1755_v2  ;;  %v1768_v17 = vld [vmem:[%s2400_s1 + $0x48] sm:$0xff]   ;;  %v1769_v18 = vld [vmem:[%s2400_s1 + $0x40] sm:$0xff]   ;;  %v1778_v22 = vld [vmem:[%s2032_s28 + $0x114] ss:$8 sps:$4 sm:$0xff]  }
  0x36   : > { %718 = vmatprep.subr.bf16.mxu0 %v1933_v0  ;;  %1682 = vmatprep.subr.bf16.mxu1 %v1933_v0  ;;  %v1770_v19 = vld [vmem:[%s2032_s28] ss:$8 sps:$4 sm:$0xff]   ;;  %v1780_v23 = vld [vmem:[%s2032_s28 + $0x10] ss:$8 sps:$4 sm:$0xff]   ;;  %v1782_v25 = vld [vmem:[%s2032_s28 + $0x24] ss:$8 sps:$4 sm:$0xff]  }
  0x37   : > { %v1773_v20 = vld [vmem:[%s2032_s28 + $0x100] ss:$8 sps:$4 sm:$0xff]   ;;  %v1781_v24 = vld [vmem:[%s2032_s28 + $0x110] ss:$8 sps:$4 sm:$0xff]   ;;  %v1784_v26 = vld [vmem:[%s2032_s28 + $0x124] ss:$8 sps:$4 sm:$0xff]  }
  0x38   : > { %v1786_v27 = vld [vmem:[%s2032_s28 + $0x20] ss:$8 sps:$4 sm:$0xff]   ;;  %v1788_v29 = vld [vmem:[%s2032_s28 + $0x34] ss:$8 sps:$4 sm:$0xff]   ;;  %v1792_v31 = vld [vmem:[%s2032_s28 + $0x30] ss:$8 sps:$4 sm:$0xff]  }
  0x39   : > { %719 = vmatpush1.bf16.msra.mxu0 %v1756_v3  ;;  %1698 = vmatpush1.bf16.msra.mxu1 %v1756_v3  ;;  %v1787_v28 = vld [vmem:[%s2032_s28 + $0x120] ss:$8 sps:$4 sm:$0xff]   ;;  %v1790_v30 = vld [vmem:[%s2032_s28 + $0x134] ss:$8 sps:$4 sm:$0xff]   ;;  %v1793_v32 = vld [vmem:[%s2032_s28 + $0x130] ss:$8 sps:$4 sm:$0xff]  }
  0x3a   : > { %720 = vmatprep.subr.bf16.mxu0 %v1933_v0  ;;  %1683 = vmatprep.subr.bf16.mxu1 %v1933_v0  ;;  %v1794_v33 = vld [vmem:[%s2032_s28 + $0x44] ss:$8 sps:$4 sm:$0xff]   ;;  %v1798_v35 = vld [vmem:[%s2032_s28 + $0x40] ss:$8 sps:$4 sm:$0xff]   ;;  %v1800_v37 = vld [vmem:[%s2032_s28 + $0x54] ss:$8 sps:$4 sm:$0xff]  }
  0x3b   : > { %v1796_v34 = vld [vmem:[%s2032_s28 + $0x144] ss:$8 sps:$4 sm:$0xff]   ;;  %v1799_v36 = vld [vmem:[%s2032_s28 + $0x140] ss:$8 sps:$4 sm:$0xff]   ;;  %v1802_v38 = vld [vmem:[%s2032_s28 + $0x154] ss:$8 sps:$4 sm:$0xff]  }
  0x3c   : > { %v1804_v39 = vld [vmem:[%s2032_s28 + $0x50] ss:$8 sps:$4 sm:$0xff]   ;;  %v1806_v41 = vld [vmem:[%s2032_s28 + $0x64] ss:$8 sps:$4 sm:$0xff]   ;;  %v1810_v43 = vld [vmem:[%s2032_s28 + $0x60] ss:$8 sps:$4 sm:$0xff]  }
  0x3d   : > { %721 = vmatpush1.bf16.msra.mxu0 %v1757_v4  ;;  %1699 = vmatpush1.bf16.msra.mxu1 %v1757_v4  ;;  %v1805_v40 = vld [vmem:[%s2032_s28 + $0x150] ss:$8 sps:$4 sm:$0xff]   ;;  %v1808_v42 = vld [vmem:[%s2032_s28 + $0x164] ss:$8 sps:$4 sm:$0xff]   ;;  %v1811_v44 = vld [vmem:[%s2032_s28 + $0x160] ss:$8 sps:$4 sm:$0xff]  }
  0x3e   : > { %722 = vmatprep.subr.bf16.mxu0 %v1933_v0  ;;  %1684 = vmatprep.subr.bf16.mxu1 %v1933_v0  ;;  %v1812_v45 = vld [vmem:[%s2032_s28 + $0x74] ss:$8 sps:$4 sm:$0xff]   ;;  %v1816_v47 = vld [vmem:[%s2032_s28 + $0x70] ss:$8 sps:$4 sm:$0xff]   ;;  %v1818_v49 = vld [vmem:[%s2032_s28 + $0x84] ss:$8 sps:$4 sm:$0xff]  }
  0x3f   : > { %v1814_v46 = vld [vmem:[%s2032_s28 + $0x174] ss:$8 sps:$4 sm:$0xff]   ;;  %v1817_v48 = vld [vmem:[%s2032_s28 + $0x170] ss:$8 sps:$4 sm:$0xff]   ;;  %v1820_v50 = vld [vmem:[%s2032_s28 + $0x184] ss:$8 sps:$4 sm:$0xff]  }
  0x40   : > { %v1822_v51 = vld [vmem:[%s2032_s28 + $0x80] ss:$8 sps:$4 sm:$0xff]   ;;  %v1824_v53 = vld [vmem:[%s2032_s28 + $0x94] ss:$8 sps:$4 sm:$0xff]   ;;  %v1828_v55 = vld [vmem:[%s2032_s28 + $0x90] ss:$8 sps:$4 sm:$0xff]  }
  0x41   : > { %723 = vmatpush1.bf16.msra.mxu0 %v1758_v5  ;;  %1700 = vmatpush1.bf16.msra.mxu1 %v1758_v5  ;;  %v1823_v52 = vld [vmem:[%s2032_s28 + $0x180] ss:$8 sps:$4 sm:$0xff]   ;;  %v1826_v54 = vld [vmem:[%s2032_s28 + $0x194] ss:$8 sps:$4 sm:$0xff]   ;;  %v1829_v56 = vld [vmem:[%s2032_s28 + $0x190] ss:$8 sps:$4 sm:$0xff]  }
  0x42   : > { %724 = vmatprep.subr.bf16.mxu0 %v1933_v0  ;;  %1685 = vmatprep.subr.bf16.mxu1 %v1933_v0  ;;  %v1830_v57 = vld [vmem:[%s2032_s28 + $0xa4] ss:$8 sps:$4 sm:$0xff]   ;;  %v1834_v59 = vld [vmem:[%s2032_s28 + $0xa0] ss:$8 sps:$4 sm:$0xff]   ;;  %v1836_v61 = vld [vmem:[%s2032_s28 + $0xb4] ss:$8 sps:$4 sm:$0xff]  }
  0x43   : > { %v1832_v58 = vld [vmem:[%s2032_s28 + $0x1a4] ss:$8 sps:$4 sm:$0xff]   ;;  %v1835_v60 = vld [vmem:[%s2032_s28 + $0x1a0] ss:$8 sps:$4 sm:$0xff]   ;;  %v1838_v62 = vld [vmem:[%s2032_s28 + $0x1b4] ss:$8 sps:$4 sm:$0xff]  }
  0x44   : > { %v1840_v63 = vld [vmem:[%s2032_s28 + $0xb0] ss:$8 sps:$4 sm:$0xff]   ;;  %v1842_v1 = vld [vmem:[%s2032_s28 + $0xc4] ss:$8 sps:$4 sm:$0xff]   ;;  %v1846_v3 = vld [vmem:[%s2032_s28 + $0xc0] ss:$8 sps:$4 sm:$0xff]  }
  0x45   : > { %725 = vmatpush1.bf16.msra.mxu0 %v1759_v7  ;;  %1701 = vmatpush1.bf16.msra.mxu1 %v1759_v7  ;;  %v1844_v2 = vld [vmem:[%s2032_s28 + $0x1c4] ss:$8 sps:$4 sm:$0xff]   ;;  %v1847_v4 = vld [vmem:[%s2032_s28 + $0x1c0] ss:$8 sps:$4 sm:$0xff]   ;;  %v1848_v5 = vld [vmem:[%s2032_s28 + $0xd4] ss:$8 sps:$4 sm:$0xff]  }
  0x46   : > { %726 = vmatprep.subr.bf16.mxu0 %v1933_v0  ;;  %1686 = vmatprep.subr.bf16.mxu1 %v1933_v0  ;;  %v1850_v6 = vld [vmem:[%s2032_s28 + $0x1d4] ss:$8 sps:$4 sm:$0xff]   ;;  %v1852_v7 = vld [vmem:[%s2032_s28 + $0xd0] ss:$8 sps:$4 sm:$0xff]  }
  0x47   : > { %v1853_v8 = vld [vmem:[%s2032_s28 + $0x1d0] ss:$8 sps:$4 sm:$0xff]  }
  0x49   : > { %727 = vmatpush1.bf16.msra.mxu0 %v1760_v9  ;;  %1702 = vmatpush1.bf16.msra.mxu1 %v1760_v9  ;;  %v1854_v9 = vld [vmem:[%s2032_s28 + $0xe4] ss:$8 sps:$4 sm:$0xff]  }
  0x4a   : > { %728 = vmatprep.subr.bf16.mxu0 %v1933_v0  ;;  %1687 = vmatprep.subr.bf16.mxu1 %v1933_v0 }
  0x4d   : > { %729 = vmatpush1.bf16.msra.mxu0 %v1761_v10  ;;  %1703 = vmatpush1.bf16.msra.mxu1 %v1761_v10  ;;  %v1856_v10 = vld [vmem:[%s2032_s28 + $0x1e4] ss:$8 sps:$4 sm:$0xff]  }
  0x4e   : > { %730 = vmatprep.subr.bf16.mxu0 %v1933_v0  ;;  %1688 = vmatprep.subr.bf16.mxu1 %v1933_v0 }
  0x51   : > { %731 = vmatpush2.bf16.msra.mxu0 %v1762_v11  ;;  %1704 = vmatpush2.bf16.msra.mxu1 %v1762_v11  ;;  %v1858_v11 = vld [vmem:[%s2032_s28 + $0xe0] ss:$8 sps:$4 sm:$0xff]  }
  0x52   : > { %732 = vmatprep.subr.bf16.mxu0 %v1933_v0  ;;  %1689 = vmatprep.subr.bf16.mxu1 %v1933_v0 }
  0x55   : > { %733 = vmatpush2.bf16.msra.mxu0 %v1763_v12  ;;  %1705 = vmatpush2.bf16.msra.mxu1 %v1763_v12  ;;  %v1859_v12 = vld [vmem:[%s2032_s28 + $0x1e0] ss:$8 sps:$4 sm:$0xff]  }
  0x56   : > { %734 = vmatprep.subr.bf16.mxu0 %v1933_v0  ;;  %1690 = vmatprep.subr.bf16.mxu1 %v1933_v0 }
  0x59   : > { %735 = vmatpush2.bf16.msra.mxu0 %v1764_v13  ;;  %1706 = vmatpush2.bf16.msra.mxu1 %v1764_v13  ;;  %v1860_v13 = vld [vmem:[%s2032_s28 + $0xf4] ss:$8 sps:$4 sm:$0xff]  }
  0x5a   : > { %736 = vmatprep.subr.bf16.mxu0 %v1933_v0  ;;  %1691 = vmatprep.subr.bf16.mxu1 %v1933_v0 }
  0x5d   : > { %737 = vmatpush2.bf16.msra.mxu0 %v1765_v14  ;;  %1707 = vmatpush2.bf16.msra.mxu1 %v1765_v14  ;;  %v1862_v14 = vld [vmem:[%s2032_s28 + $0x1f4] ss:$8 sps:$4 sm:$0xff]  }
  0x5e   : > { %738 = vmatprep.subr.bf16.mxu0 %v1933_v0  ;;  %1692 = vmatprep.subr.bf16.mxu1 %v1933_v0 }
  0x61   : > { %739 = vmatpush2.bf16.msra.mxu0 %v1766_v15  ;;  %1708 = vmatpush2.bf16.msra.mxu1 %v1766_v15  ;;  %v1864_v15 = vld [vmem:[%s2032_s28 + $0xf0] ss:$8 sps:$4 sm:$0xff]  }
  0x62   : > { %740 = vmatprep.subr.bf16.mxu0 %v1933_v0  ;;  %1693 = vmatprep.subr.bf16.mxu1 %v1933_v0 }
  0x65   : > { %741 = vmatpush2.bf16.msra.mxu0 %v1767_v16  ;;  %1709 = vmatpush2.bf16.msra.mxu1 %v1767_v16  ;;  %v1865_v16 = vld [vmem:[%s2032_s28 + $0x1f0] ss:$8 sps:$4 sm:$0xff]  }
  0x66   : > { %742 = vmatprep.subr.bf16.mxu0 %v1933_v0  ;;  %1694 = vmatprep.subr.bf16.mxu1 %v1933_v0 }
  0x69   : > { %743 = vmatpush2.bf16.msra.mxu0 %v1768_v17  ;;  %1710 = vmatpush2.bf16.msra.mxu1 %v1768_v17  ;;  %v2187_v17 = vld [vmem:[%s2401_s2] ss:$0 sm:$0xff] }
  0x6a   : > { %744 = vmatprep.subr.bf16.mxu0 %v1933_v0  ;;  %1695 = vmatprep.subr.bf16.mxu1 %v1933_v0  ;;  %v1841_v0 = vld [vmem:[%s2032_s28 + $0x1b0] ss:$8 sps:$4 sm:$0xff]   ;;  %s2194_s28 = scalar_lea.vmem %s2402_s3, %s1466_s22 }
  0x6d   : > { %745 = vmatpush2.bf16.msra.mxu0 %v1769_v18  ;;  %1711 = vmatpush2.bf16.msra.mxu1 %v1769_v18 }
  0x70   : > { %747 = vmatmul.mubr.bf16.vlgmr.msra.gmra.mxu0 %v1770_v19  ;;  %875 = vmatmul.mubr.bf16.vlgmr.msra.gmra.mxu1 %v1773_v20 }
  0x71   : > { %754 = vmatprep.mubr.bf16.mxu0 %v1776_v21  ;;  %882 = vmatprep.mubr.bf16.mxu1 %v1778_v22 }
  0x78   : > { %755 = vmatmul.mubr.bf16.gmra.mxu0 %v1780_v23  ;;  %883 = vmatmul.mubr.bf16.gmra.mxu1 %v1781_v24 }
  0x79   : > { %762 = vmatprep.mubr.bf16.mxu0 %v1782_v25  ;;  %890 = vmatprep.mubr.bf16.mxu1 %v1784_v26 }
  0x80   : > { %763 = vmatmul.mubr.bf16.gmra.mxu0 %v1786_v27  ;;  %891 = vmatmul.mubr.bf16.gmra.mxu1 %v1787_v28 }
  0x81   : > { %770 = vmatprep.mubr.bf16.mxu0 %v1788_v29  ;;  %898 = vmatprep.mubr.bf16.mxu1 %v1790_v30 }
  0x88   : > { %771 = vmatmul.mubr.bf16.gmra.mxu0 %v1792_v31  ;;  %899 = vmatmul.mubr.bf16.gmra.mxu1 %v1793_v32 }
  0x89   : > { %778 = vmatprep.mubr.bf16.mxu0 %v1794_v33  ;;  %906 = vmatprep.mubr.bf16.mxu1 %v1796_v34 }
  0x90   : > { %779 = vmatmul.mubr.bf16.gmra.mxu0 %v1798_v35  ;;  %907 = vmatmul.mubr.bf16.gmra.mxu1 %v1799_v36 }
  0x91   : > { %786 = vmatprep.mubr.bf16.mxu0 %v1800_v37  ;;  %914 = vmatprep.mubr.bf16.mxu1 %v1802_v38 }
  0x98   : > { %787 = vmatmul.mubr.bf16.gmra.mxu0 %v1804_v39  ;;  %915 = vmatmul.mubr.bf16.gmra.mxu1 %v1805_v40 }
  0x99   : > { %794 = vmatprep.mubr.bf16.mxu0 %v1806_v41  ;;  %922 = vmatprep.mubr.bf16.mxu1 %v1808_v42 }
  0xa0   : > { %795 = vmatmul.mubr.bf16.gmra.mxu0 %v1810_v43  ;;  %923 = vmatmul.mubr.bf16.gmra.mxu1 %v1811_v44 }
  0xa1   : > { %802 = vmatprep.mubr.bf16.mxu0 %v1812_v45  ;;  %930 = vmatprep.mubr.bf16.mxu1 %v1814_v46 }
  0xa8   : > { %803 = vmatmul.mubr.bf16.gmra.mxu0 %v1816_v47  ;;  %931 = vmatmul.mubr.bf16.gmra.mxu1 %v1817_v48 }
  0xa9   : > { %810 = vmatprep.mubr.bf16.mxu0 %v1818_v49  ;;  %938 = vmatprep.mubr.bf16.mxu1 %v1820_v50 }
  0xb0   : > { %811 = vmatmul.mubr.bf16.gmra.mxu0 %v1822_v51  ;;  %939 = vmatmul.mubr.bf16.gmra.mxu1 %v1823_v52 }
  0xb1   : > { %818 = vmatprep.mubr.bf16.mxu0 %v1824_v53  ;;  %946 = vmatprep.mubr.bf16.mxu1 %v1826_v54 }
  0xb8   : > { %819 = vmatmul.mubr.bf16.gmra.mxu0 %v1828_v55  ;;  %947 = vmatmul.mubr.bf16.gmra.mxu1 %v1829_v56 }
  0xb9   : > { %826 = vmatprep.mubr.bf16.mxu0 %v1830_v57  ;;  %954 = vmatprep.mubr.bf16.mxu1 %v1832_v58 }
  0xc0   : > { %827 = vmatmul.mubr.bf16.gmra.mxu0 %v1834_v59  ;;  %955 = vmatmul.mubr.bf16.gmra.mxu1 %v1835_v60 }
  0xc1   : > { %834 = vmatprep.mubr.bf16.mxu0 %v1836_v61  ;;  %962 = vmatprep.mubr.bf16.mxu1 %v1838_v62 }
  0xc8   : > { %835 = vmatmul.mubr.bf16.gmra.mxu0 %v1840_v63  ;;  %963 = vmatmul.mubr.bf16.gmra.mxu1 %v1841_v0 }
  0xc9   : > { %842 = vmatprep.mubr.bf16.mxu0 %v1842_v1  ;;  %970 = vmatprep.mubr.bf16.mxu1 %v1844_v2 }
  0xd0   : > { %843 = vmatmul.mubr.bf16.gmra.mxu0 %v1846_v3  ;;  %971 = vmatmul.mubr.bf16.gmra.mxu1 %v1847_v4 }
  0xd1   : > { %850 = vmatprep.mubr.bf16.mxu0 %v1848_v5  ;;  %978 = vmatprep.mubr.bf16.mxu1 %v1850_v6 }
  0xd8   : > { %851 = vmatmul.mubr.bf16.gmra.mxu0 %v1852_v7  ;;  %979 = vmatmul.mubr.bf16.gmra.mxu1 %v1853_v8 }
  0xd9   : > { %858 = vmatprep.mubr.bf16.mxu0 %v1854_v9  ;;  %986 = vmatprep.mubr.bf16.mxu1 %v1856_v10 }
  0xe0   : > { %859 = vmatmul.mubr.bf16.gmra.mxu0 %v1858_v11  ;;  %987 = vmatmul.mubr.bf16.gmra.mxu1 %v1859_v12 }
  0xe1   : > { %866 = vmatprep.mubr.bf16.mxu0 %v1860_v13  ;;  %994 = vmatprep.mubr.bf16.mxu1 %v1862_v14 }
  0xe8   : > { %867 = vmatmul.mubr.bf16.gmra.mxu0 %v1864_v15  ;;  %995 = vmatmul.mubr.bf16.gmra.mxu1 %v1865_v16 }
 0x130   : > { %v748_v18 = vpop.f32.mrf.mxu0  ;;  %v876_v19 = vpop.f32.mrf.mxu1 }
 0x131   : > { %v749_v20 = vadd.f32 %v2187_v17, %v748_v18  ;;  %v877_v21 = vadd.f32 %v2187_v17, %v876_v19 }
 0x132   : > { %v750_v22 = vpop.f32.mrf.mxu0  ;;  %v878_v23 = vpop.f32.mrf.mxu1 }
 0x133   : > { %v1003_v24 = vmax.f32 %v749_v20, 0.0  ;;  %v1035_v25 = vmax.f32 %v877_v21, 0.0 }
 0x134   : > { %v751_v26 = vpop.f32.mrf.mxu0  ;;  %v879_v27 = vpop.f32.mrf.mxu1 }
 0x135   : > { %v1616_v28 = vpack.c.bf16 %v1003_v24, %v1003_v24  ;;  %v1648_v29 = vpack.c.bf16 %v1035_v25, %v1035_v25  ;;  %v752_v30 = vadd.f32 %v2187_v17, %v751_v26  ;;  %v880_v31 = vadd.f32 %v2187_v17, %v879_v27 }
 0x136   : > { %v753_v32 = vpop.f32.mrf.mxu0  ;;  %v881_v33 = vpop.f32.mrf.mxu1 }
 0x137   : > { %1324 = vst.msk [vmem:[%s2194_s28] sm:$0xf] %vm1323_vm0, %v1616_v28  ;;  %1356 = vst.msk [vmem:[%s2194_s28 + $0x80] sm:$0xf] %vm1323_vm0, %v1648_v29  ;;  %v1004_v34 = vmax.f32 %v752_v30, 0.0  ;;  %v1036_v35 = vmax.f32 %v880_v31, 0.0 }
 0x138   : > { %v756_v36 = vpop.f32.mrf.mxu0  ;;  %v884_v37 = vpop.f32.mrf.mxu1 }
 0x139   : > { %v1617_v38 = vpack.c.bf16 %v1004_v34, %v1004_v34  ;;  %v1649_v39 = vpack.c.bf16 %v1036_v35, %v1036_v35  ;;  %v757_v40 = vadd.f32 %v2187_v17, %v756_v36  ;;  %v885_v41 = vadd.f32 %v2187_v17, %v884_v37 }
 0x13a   : > { %v758_v42 = vpop.f32.mrf.mxu0  ;;  %v886_v43 = vpop.f32.mrf.mxu1 }
 0x13b   : > { %1325 = vst.msk [vmem:[%s2194_s28 + $0x4] sm:$0xf] %vm1323_vm0, %v1617_v38  ;;  %1357 = vst.msk [vmem:[%s2194_s28 + $0x84] sm:$0xf] %vm1323_vm0, %v1649_v39  ;;  %v1005_v44 = vmax.f32 %v757_v40, 0.0  ;;  %v1037_v45 = vmax.f32 %v885_v41, 0.0 }
 0x13c   : > { %v759_v46 = vpop.f32.mrf.mxu0  ;;  %v887_v47 = vpop.f32.mrf.mxu1 }
 0x13d   : > { %v1618_v48 = vpack.c.bf16 %v1005_v44, %v1005_v44  ;;  %v1650_v49 = vpack.c.bf16 %v1037_v45, %v1037_v45  ;;  %v760_v50 = vadd.f32 %v2187_v17, %v759_v46  ;;  %v888_v51 = vadd.f32 %v2187_v17, %v887_v47 }
 0x13e   : > { %v761_v52 = vpop.f32.mrf.mxu0  ;;  %v889_v53 = vpop.f32.mrf.mxu1 }
 0x13f   : > { %1326 = vst.msk [vmem:[%s2194_s28 + $0x8] sm:$0xf] %vm1323_vm0, %v1618_v48  ;;  %1358 = vst.msk [vmem:[%s2194_s28 + $0x88] sm:$0xf] %vm1323_vm0, %v1650_v49  ;;  %v1006_v54 = vmax.f32 %v760_v50, 0.0  ;;  %v1038_v55 = vmax.f32 %v888_v51, 0.0 }
 0x140   : > { %v764_v56 = vpop.f32.mrf.mxu0  ;;  %v892_v57 = vpop.f32.mrf.mxu1 }
 0x141   : > { %v1619_v58 = vpack.c.bf16 %v1006_v54, %v1006_v54  ;;  %v1651_v59 = vpack.c.bf16 %v1038_v55, %v1038_v55  ;;  %v765_v60 = vadd.f32 %v2187_v17, %v764_v56  ;;  %v893_v61 = vadd.f32 %v2187_v17, %v892_v57 }
 0x142   : > { %v766_v62 = vpop.f32.mrf.mxu0  ;;  %v894_v63 = vpop.f32.mrf.mxu1 }
 0x143   : > { %1327 = vst.msk [vmem:[%s2194_s28 + $0xc] sm:$0xf] %vm1323_vm0, %v1619_v58  ;;  %1359 = vst.msk [vmem:[%s2194_s28 + $0x8c] sm:$0xf] %vm1323_vm0, %v1651_v59  ;;  %v1007_v0 = vmax.f32 %v765_v60, 0.0  ;;  %v1039_v1 = vmax.f32 %v893_v61, 0.0 }
 0x144   : > { %v767_v2 = vpop.f32.mrf.mxu0  ;;  %v895_v3 = vpop.f32.mrf.mxu1 }
 0x145   : > { %v1620_v4 = vpack.c.bf16 %v1007_v0, %v1007_v0  ;;  %v1652_v5 = vpack.c.bf16 %v1039_v1, %v1039_v1  ;;  %v768_v6 = vadd.f32 %v2187_v17, %v767_v2  ;;  %v896_v7 = vadd.f32 %v2187_v17, %v895_v3 }
 0x146   : > { %v769_v8 = vpop.f32.mrf.mxu0  ;;  %v897_v9 = vpop.f32.mrf.mxu1 }
 0x147   : > { %1328 = vst.msk [vmem:[%s2194_s28 + $0x10] sm:$0xf] %vm1323_vm0, %v1620_v4  ;;  %1360 = vst.msk [vmem:[%s2194_s28 + $0x90] sm:$0xf] %vm1323_vm0, %v1652_v5  ;;  %v1008_v10 = vmax.f32 %v768_v6, 0.0  ;;  %v1040_v11 = vmax.f32 %v896_v7, 0.0 }
 0x148   : > { %v772_v12 = vpop.f32.mrf.mxu0  ;;  %v900_v13 = vpop.f32.mrf.mxu1 }
 0x149   : > { %v1621_v14 = vpack.c.bf16 %v1008_v10, %v1008_v10  ;;  %v1653_v15 = vpack.c.bf16 %v1040_v11, %v1040_v11  ;;  %v773_v16 = vadd.f32 %v2187_v17, %v772_v12  ;;  %v901_v18 = vadd.f32 %v2187_v17, %v900_v13 }
 0x14a   : > { %v774_v19 = vpop.f32.mrf.mxu0  ;;  %v902_v20 = vpop.f32.mrf.mxu1 }
 0x14b   : > { %1329 = vst.msk [vmem:[%s2194_s28 + $0x14] sm:$0xf] %vm1323_vm0, %v1621_v14  ;;  %1361 = vst.msk [vmem:[%s2194_s28 + $0x94] sm:$0xf] %vm1323_vm0, %v1653_v15  ;;  %v1009_v21 = vmax.f32 %v773_v16, 0.0  ;;  %v1041_v22 = vmax.f32 %v901_v18, 0.0 }
 0x14c   : > { %v775_v23 = vpop.f32.mrf.mxu0  ;;  %v903_v24 = vpop.f32.mrf.mxu1 }
 0x14d   : > { %v1622_v25 = vpack.c.bf16 %v1009_v21, %v1009_v21  ;;  %v1654_v26 = vpack.c.bf16 %v1041_v22, %v1041_v22  ;;  %v776_v27 = vadd.f32 %v2187_v17, %v775_v23  ;;  %v904_v28 = vadd.f32 %v2187_v17, %v903_v24 }
 0x14e   : > { %v777_v29 = vpop.f32.mrf.mxu0  ;;  %v905_v30 = vpop.f32.mrf.mxu1 }
 0x14f   : > { %1330 = vst.msk [vmem:[%s2194_s28 + $0x18] sm:$0xf] %vm1323_vm0, %v1622_v25  ;;  %1362 = vst.msk [vmem:[%s2194_s28 + $0x98] sm:$0xf] %vm1323_vm0, %v1654_v26  ;;  %v1010_v31 = vmax.f32 %v776_v27, 0.0  ;;  %v1042_v32 = vmax.f32 %v904_v28, 0.0 }
 0x150   : > { %v780_v33 = vpop.f32.mrf.mxu0  ;;  %v908_v34 = vpop.f32.mrf.mxu1 }
 0x151   : > { %v1623_v35 = vpack.c.bf16 %v1010_v31, %v1010_v31  ;;  %v1655_v36 = vpack.c.bf16 %v1042_v32, %v1042_v32  ;;  %v781_v37 = vadd.f32 %v2187_v17, %v780_v33  ;;  %v909_v38 = vadd.f32 %v2187_v17, %v908_v34 }
 0x152   : > { %v782_v39 = vpop.f32.mrf.mxu0  ;;  %v910_v40 = vpop.f32.mrf.mxu1 }
 0x153   : > { %1331 = vst.msk [vmem:[%s2194_s28 + $0x1c] sm:$0xf] %vm1323_vm0, %v1623_v35  ;;  %1363 = vst.msk [vmem:[%s2194_s28 + $0x9c] sm:$0xf] %vm1323_vm0, %v1655_v36  ;;  %v1011_v41 = vmax.f32 %v781_v37, 0.0  ;;  %v1043_v42 = vmax.f32 %v909_v38, 0.0 }
 0x154   : > { %v783_v43 = vpop.f32.mrf.mxu0  ;;  %v911_v44 = vpop.f32.mrf.mxu1 }
 0x155   : > { %v1624_v45 = vpack.c.bf16 %v1011_v41, %v1011_v41  ;;  %v1656_v46 = vpack.c.bf16 %v1043_v42, %v1043_v42  ;;  %v784_v47 = vadd.f32 %v2187_v17, %v783_v43  ;;  %v912_v48 = vadd.f32 %v2187_v17, %v911_v44 }
 0x156   : > { %v785_v49 = vpop.f32.mrf.mxu0  ;;  %v913_v50 = vpop.f32.mrf.mxu1 }
 0x157   : > { %1332 = vst.msk [vmem:[%s2194_s28 + $0x20] sm:$0xf] %vm1323_vm0, %v1624_v45  ;;  %1364 = vst.msk [vmem:[%s2194_s28 + $0xa0] sm:$0xf] %vm1323_vm0, %v1656_v46  ;;  %v1012_v51 = vmax.f32 %v784_v47, 0.0  ;;  %v1044_v52 = vmax.f32 %v912_v48, 0.0 }
 0x158   : > { %v788_v53 = vpop.f32.mrf.mxu0  ;;  %v916_v54 = vpop.f32.mrf.mxu1 }
 0x159   : > { %v1625_v55 = vpack.c.bf16 %v1012_v51, %v1012_v51  ;;  %v1657_v56 = vpack.c.bf16 %v1044_v52, %v1044_v52  ;;  %v789_v57 = vadd.f32 %v2187_v17, %v788_v53  ;;  %v917_v58 = vadd.f32 %v2187_v17, %v916_v54 }
 0x15a   : > { %v790_v59 = vpop.f32.mrf.mxu0  ;;  %v918_v60 = vpop.f32.mrf.mxu1 }
 0x15b   : > { %1333 = vst.msk [vmem:[%s2194_s28 + $0x24] sm:$0xf] %vm1323_vm0, %v1625_v55  ;;  %1365 = vst.msk [vmem:[%s2194_s28 + $0xa4] sm:$0xf] %vm1323_vm0, %v1657_v56  ;;  %v1013_v61 = vmax.f32 %v789_v57, 0.0  ;;  %v1045_v62 = vmax.f32 %v917_v58, 0.0 }
 0x15c   : > { %v791_v63 = vpop.f32.mrf.mxu0  ;;  %v919_v0 = vpop.f32.mrf.mxu1 }
 0x15d   : > { %v1626_v1 = vpack.c.bf16 %v1013_v61, %v1013_v61  ;;  %v1658_v2 = vpack.c.bf16 %v1045_v62, %v1045_v62  ;;  %v792_v3 = vadd.f32 %v2187_v17, %v791_v63  ;;  %v920_v4 = vadd.f32 %v2187_v17, %v919_v0 }
 0x15e   : > { %v793_v5 = vpop.f32.mrf.mxu0  ;;  %v921_v6 = vpop.f32.mrf.mxu1 }
 0x15f   : > { %1334 = vst.msk [vmem:[%s2194_s28 + $0x28] sm:$0xf] %vm1323_vm0, %v1626_v1  ;;  %1366 = vst.msk [vmem:[%s2194_s28 + $0xa8] sm:$0xf] %vm1323_vm0, %v1658_v2  ;;  %v1014_v7 = vmax.f32 %v792_v3, 0.0  ;;  %v1046_v8 = vmax.f32 %v920_v4, 0.0 }
 0x160   : > { %v796_v9 = vpop.f32.mrf.mxu0  ;;  %v924_v10 = vpop.f32.mrf.mxu1 }
 0x161   : > { %v1627_v11 = vpack.c.bf16 %v1014_v7, %v1014_v7  ;;  %v1659_v12 = vpack.c.bf16 %v1046_v8, %v1046_v8  ;;  %v797_v13 = vadd.f32 %v2187_v17, %v796_v9  ;;  %v925_v14 = vadd.f32 %v2187_v17, %v924_v10 }
 0x162   : > { %v798_v15 = vpop.f32.mrf.mxu0  ;;  %v926_v16 = vpop.f32.mrf.mxu1 }
 0x163   : > { %1335 = vst.msk [vmem:[%s2194_s28 + $0x2c] sm:$0xf] %vm1323_vm0, %v1627_v11  ;;  %1367 = vst.msk [vmem:[%s2194_s28 + $0xac] sm:$0xf] %vm1323_vm0, %v1659_v12  ;;  %v1015_v18 = vmax.f32 %v797_v13, 0.0  ;;  %v1047_v19 = vmax.f32 %v925_v14, 0.0 }
 0x164   : > { %v799_v20 = vpop.f32.mrf.mxu0  ;;  %v927_v21 = vpop.f32.mrf.mxu1 }
 0x165   : > { %v1628_v22 = vpack.c.bf16 %v1015_v18, %v1015_v18  ;;  %v1660_v23 = vpack.c.bf16 %v1047_v19, %v1047_v19  ;;  %v800_v24 = vadd.f32 %v2187_v17, %v799_v20  ;;  %v928_v25 = vadd.f32 %v2187_v17, %v927_v21 }
 0x166   : > { %v801_v26 = vpop.f32.mrf.mxu0  ;;  %v929_v27 = vpop.f32.mrf.mxu1 }
 0x167   : > { %1336 = vst.msk [vmem:[%s2194_s28 + $0x30] sm:$0xf] %vm1323_vm0, %v1628_v22  ;;  %1368 = vst.msk [vmem:[%s2194_s28 + $0xb0] sm:$0xf] %vm1323_vm0, %v1660_v23  ;;  %v1016_v28 = vmax.f32 %v800_v24, 0.0  ;;  %v1048_v29 = vmax.f32 %v928_v25, 0.0 }
 0x168   : > { %v804_v30 = vpop.f32.mrf.mxu0  ;;  %v932_v31 = vpop.f32.mrf.mxu1 }
 0x169   : > { %v1629_v32 = vpack.c.bf16 %v1016_v28, %v1016_v28  ;;  %v1661_v33 = vpack.c.bf16 %v1048_v29, %v1048_v29  ;;  %v805_v34 = vadd.f32 %v2187_v17, %v804_v30  ;;  %v933_v35 = vadd.f32 %v2187_v17, %v932_v31 }
 0x16a   : > { %v806_v36 = vpop.f32.mrf.mxu0  ;;  %v934_v37 = vpop.f32.mrf.mxu1 }
 0x16b   : > { %1337 = vst.msk [vmem:[%s2194_s28 + $0x34] sm:$0xf] %vm1323_vm0, %v1629_v32  ;;  %1369 = vst.msk [vmem:[%s2194_s28 + $0xb4] sm:$0xf] %vm1323_vm0, %v1661_v33  ;;  %v1017_v38 = vmax.f32 %v805_v34, 0.0  ;;  %v1049_v39 = vmax.f32 %v933_v35, 0.0 }
 0x16c   : > { %v807_v40 = vpop.f32.mrf.mxu0  ;;  %v935_v41 = vpop.f32.mrf.mxu1 }
 0x16d   : > { %v1630_v42 = vpack.c.bf16 %v1017_v38, %v1017_v38  ;;  %v1662_v43 = vpack.c.bf16 %v1049_v39, %v1049_v39  ;;  %v808_v44 = vadd.f32 %v2187_v17, %v807_v40  ;;  %v936_v45 = vadd.f32 %v2187_v17, %v935_v41 }
 0x16e   : > { %v809_v46 = vpop.f32.mrf.mxu0  ;;  %v937_v47 = vpop.f32.mrf.mxu1 }
 0x16f   : > { %1338 = vst.msk [vmem:[%s2194_s28 + $0x38] sm:$0xf] %vm1323_vm0, %v1630_v42  ;;  %1370 = vst.msk [vmem:[%s2194_s28 + $0xb8] sm:$0xf] %vm1323_vm0, %v1662_v43  ;;  %v1018_v48 = vmax.f32 %v808_v44, 0.0  ;;  %v1050_v49 = vmax.f32 %v936_v45, 0.0 }
 0x170   : > { %v812_v50 = vpop.f32.mrf.mxu0  ;;  %v940_v51 = vpop.f32.mrf.mxu1 }
 0x171   : > { %v1631_v52 = vpack.c.bf16 %v1018_v48, %v1018_v48  ;;  %v1663_v53 = vpack.c.bf16 %v1050_v49, %v1050_v49  ;;  %v813_v54 = vadd.f32 %v2187_v17, %v812_v50  ;;  %v941_v55 = vadd.f32 %v2187_v17, %v940_v51 }
 0x172   : > { %v814_v56 = vpop.f32.mrf.mxu0  ;;  %v942_v57 = vpop.f32.mrf.mxu1 }
 0x173   : > { %1339 = vst.msk [vmem:[%s2194_s28 + $0x3c] sm:$0xf] %vm1323_vm0, %v1631_v52  ;;  %1371 = vst.msk [vmem:[%s2194_s28 + $0xbc] sm:$0xf] %vm1323_vm0, %v1663_v53  ;;  %v1019_v58 = vmax.f32 %v813_v54, 0.0  ;;  %v1051_v59 = vmax.f32 %v941_v55, 0.0 }
 0x174   : > { %v815_v60 = vpop.f32.mrf.mxu0  ;;  %v943_v61 = vpop.f32.mrf.mxu1 }
 0x175   : > { %v1632_v62 = vpack.c.bf16 %v1019_v58, %v1019_v58  ;;  %v1664_v63 = vpack.c.bf16 %v1051_v59, %v1051_v59  ;;  %v816_v0 = vadd.f32 %v2187_v17, %v815_v60  ;;  %v944_v1 = vadd.f32 %v2187_v17, %v943_v61 }
 0x176   : > { %v817_v2 = vpop.f32.mrf.mxu0  ;;  %v945_v3 = vpop.f32.mrf.mxu1 }
 0x177   : > { %1340 = vst.msk [vmem:[%s2194_s28 + $0x40] sm:$0xf] %vm1323_vm0, %v1632_v62  ;;  %1372 = vst.msk [vmem:[%s2194_s28 + $0xc0] sm:$0xf] %vm1323_vm0, %v1664_v63  ;;  %v1020_v4 = vmax.f32 %v816_v0, 0.0  ;;  %v1052_v5 = vmax.f32 %v944_v1, 0.0 }
 0x178   : > { %v820_v6 = vpop.f32.mrf.mxu0  ;;  %v948_v7 = vpop.f32.mrf.mxu1 }
 0x179   : > { %v1633_v8 = vpack.c.bf16 %v1020_v4, %v1020_v4  ;;  %v1665_v9 = vpack.c.bf16 %v1052_v5, %v1052_v5  ;;  %v821_v10 = vadd.f32 %v2187_v17, %v820_v6  ;;  %v949_v11 = vadd.f32 %v2187_v17, %v948_v7 }
 0x17a   : > { %v822_v12 = vpop.f32.mrf.mxu0  ;;  %v950_v13 = vpop.f32.mrf.mxu1 }
 0x17b   : > { %1341 = vst.msk [vmem:[%s2194_s28 + $0x44] sm:$0xf] %vm1323_vm0, %v1633_v8  ;;  %1373 = vst.msk [vmem:[%s2194_s28 + $0xc4] sm:$0xf] %vm1323_vm0, %v1665_v9  ;;  %v1021_v14 = vmax.f32 %v821_v10, 0.0  ;;  %v1053_v15 = vmax.f32 %v949_v11, 0.0 }
 0x17c   : > { %v823_v16 = vpop.f32.mrf.mxu0  ;;  %v951_v18 = vpop.f32.mrf.mxu1 }
 0x17d   : > { %v1634_v19 = vpack.c.bf16 %v1021_v14, %v1021_v14  ;;  %v1666_v20 = vpack.c.bf16 %v1053_v15, %v1053_v15  ;;  %v824_v21 = vadd.f32 %v2187_v17, %v823_v16  ;;  %v952_v22 = vadd.f32 %v2187_v17, %v951_v18 }
 0x17e   : > { %v825_v23 = vpop.f32.mrf.mxu0  ;;  %v953_v24 = vpop.f32.mrf.mxu1 }
 0x17f   : > { %1342 = vst.msk [vmem:[%s2194_s28 + $0x48] sm:$0xf] %vm1323_vm0, %v1634_v19  ;;  %1374 = vst.msk [vmem:[%s2194_s28 + $0xc8] sm:$0xf] %vm1323_vm0, %v1666_v20  ;;  %v1022_v25 = vmax.f32 %v824_v21, 0.0  ;;  %v1054_v26 = vmax.f32 %v952_v22, 0.0 }
 0x180   : > { %v828_v27 = vpop.f32.mrf.mxu0  ;;  %v956_v28 = vpop.f32.mrf.mxu1 }
 0x181   : > { %v1635_v29 = vpack.c.bf16 %v1022_v25, %v1022_v25  ;;  %v1667_v30 = vpack.c.bf16 %v1054_v26, %v1054_v26  ;;  %v829_v31 = vadd.f32 %v2187_v17, %v828_v27  ;;  %v957_v32 = vadd.f32 %v2187_v17, %v956_v28 }
 0x182   : > { %v830_v33 = vpop.f32.mrf.mxu0  ;;  %v958_v34 = vpop.f32.mrf.mxu1 }
 0x183   : > { %1343 = vst.msk [vmem:[%s2194_s28 + $0x4c] sm:$0xf] %vm1323_vm0, %v1635_v29  ;;  %1375 = vst.msk [vmem:[%s2194_s28 + $0xcc] sm:$0xf] %vm1323_vm0, %v1667_v30  ;;  %v1023_v35 = vmax.f32 %v829_v31, 0.0  ;;  %v1055_v36 = vmax.f32 %v957_v32, 0.0 }
 0x184   : > { %v831_v37 = vpop.f32.mrf.mxu0  ;;  %v959_v38 = vpop.f32.mrf.mxu1 }
 0x185   : > { %v1636_v39 = vpack.c.bf16 %v1023_v35, %v1023_v35  ;;  %v1668_v40 = vpack.c.bf16 %v1055_v36, %v1055_v36  ;;  %v832_v41 = vadd.f32 %v2187_v17, %v831_v37  ;;  %v960_v42 = vadd.f32 %v2187_v17, %v959_v38 }
 0x186   : > { %v833_v43 = vpop.f32.mrf.mxu0  ;;  %v961_v44 = vpop.f32.mrf.mxu1 }
 0x187   : > { %1344 = vst.msk [vmem:[%s2194_s28 + $0x50] sm:$0xf] %vm1323_vm0, %v1636_v39  ;;  %1376 = vst.msk [vmem:[%s2194_s28 + $0xd0] sm:$0xf] %vm1323_vm0, %v1668_v40  ;;  %v1024_v45 = vmax.f32 %v832_v41, 0.0  ;;  %v1056_v46 = vmax.f32 %v960_v42, 0.0 }
 0x188   : > { %v836_v47 = vpop.f32.mrf.mxu0  ;;  %v964_v48 = vpop.f32.mrf.mxu1 }
 0x189   : > { %v1637_v49 = vpack.c.bf16 %v1024_v45, %v1024_v45  ;;  %v1669_v50 = vpack.c.bf16 %v1056_v46, %v1056_v46  ;;  %v837_v51 = vadd.f32 %v2187_v17, %v836_v47  ;;  %v965_v52 = vadd.f32 %v2187_v17, %v964_v48 }
 0x18a   : > { %v838_v53 = vpop.f32.mrf.mxu0  ;;  %v966_v54 = vpop.f32.mrf.mxu1 }
 0x18b   : > { %1345 = vst.msk [vmem:[%s2194_s28 + $0x54] sm:$0xf] %vm1323_vm0, %v1637_v49  ;;  %1377 = vst.msk [vmem:[%s2194_s28 + $0xd4] sm:$0xf] %vm1323_vm0, %v1669_v50  ;;  %v1025_v55 = vmax.f32 %v837_v51, 0.0  ;;  %v1057_v56 = vmax.f32 %v965_v52, 0.0 }
 0x18c   : > { %v839_v57 = vpop.f32.mrf.mxu0  ;;  %v967_v58 = vpop.f32.mrf.mxu1 }
 0x18d   : > { %v1638_v59 = vpack.c.bf16 %v1025_v55, %v1025_v55  ;;  %v1670_v60 = vpack.c.bf16 %v1057_v56, %v1057_v56  ;;  %v840_v61 = vadd.f32 %v2187_v17, %v839_v57  ;;  %v968_v62 = vadd.f32 %v2187_v17, %v967_v58 }
 0x18e   : > { %v841_v63 = vpop.f32.mrf.mxu0  ;;  %v969_v0 = vpop.f32.mrf.mxu1 }
 0x18f   : > { %1346 = vst.msk [vmem:[%s2194_s28 + $0x58] sm:$0xf] %vm1323_vm0, %v1638_v59  ;;  %1378 = vst.msk [vmem:[%s2194_s28 + $0xd8] sm:$0xf] %vm1323_vm0, %v1670_v60  ;;  %v1026_v1 = vmax.f32 %v840_v61, 0.0  ;;  %v1058_v2 = vmax.f32 %v968_v62, 0.0 }
 0x190   : > { %v844_v3 = vpop.f32.mrf.mxu0  ;;  %v972_v4 = vpop.f32.mrf.mxu1 }
 0x191   : > { %v1639_v5 = vpack.c.bf16 %v1026_v1, %v1026_v1  ;;  %v1671_v6 = vpack.c.bf16 %v1058_v2, %v1058_v2  ;;  %v845_v7 = vadd.f32 %v2187_v17, %v844_v3  ;;  %v973_v8 = vadd.f32 %v2187_v17, %v972_v4 }
 0x192   : > { %v846_v9 = vpop.f32.mrf.mxu0  ;;  %v974_v10 = vpop.f32.mrf.mxu1 }
 0x193   : > { %1347 = vst.msk [vmem:[%s2194_s28 + $0x5c] sm:$0xf] %vm1323_vm0, %v1639_v5  ;;  %1379 = vst.msk [vmem:[%s2194_s28 + $0xdc] sm:$0xf] %vm1323_vm0, %v1671_v6  ;;  %v1027_v11 = vmax.f32 %v845_v7, 0.0  ;;  %v1059_v12 = vmax.f32 %v973_v8, 0.0 }
 0x194   : > { %v847_v13 = vpop.f32.mrf.mxu0  ;;  %v975_v14 = vpop.f32.mrf.mxu1 }
 0x195   : > { %v1640_v15 = vpack.c.bf16 %v1027_v11, %v1027_v11  ;;  %v1672_v16 = vpack.c.bf16 %v1059_v12, %v1059_v12  ;;  %v848_v18 = vadd.f32 %v2187_v17, %v847_v13  ;;  %v976_v19 = vadd.f32 %v2187_v17, %v975_v14 }
 0x196   : > { %v849_v20 = vpop.f32.mrf.mxu0  ;;  %v977_v21 = vpop.f32.mrf.mxu1 }
 0x197   : > { %1348 = vst.msk [vmem:[%s2194_s28 + $0x60] sm:$0xf] %vm1323_vm0, %v1640_v15  ;;  %1380 = vst.msk [vmem:[%s2194_s28 + $0xe0] sm:$0xf] %vm1323_vm0, %v1672_v16  ;;  %v1028_v22 = vmax.f32 %v848_v18, 0.0  ;;  %v1060_v23 = vmax.f32 %v976_v19, 0.0 }
 0x198   : > { %v852_v24 = vpop.f32.mrf.mxu0  ;;  %v980_v25 = vpop.f32.mrf.mxu1 }
 0x199   : > { %v1641_v26 = vpack.c.bf16 %v1028_v22, %v1028_v22  ;;  %v1673_v27 = vpack.c.bf16 %v1060_v23, %v1060_v23  ;;  %v853_v28 = vadd.f32 %v2187_v17, %v852_v24  ;;  %v981_v29 = vadd.f32 %v2187_v17, %v980_v25 }
 0x19a   : > { %v854_v30 = vpop.f32.mrf.mxu0  ;;  %v982_v31 = vpop.f32.mrf.mxu1 }
 0x19b   : > { %1349 = vst.msk [vmem:[%s2194_s28 + $0x64] sm:$0xf] %vm1323_vm0, %v1641_v26  ;;  %1381 = vst.msk [vmem:[%s2194_s28 + $0xe4] sm:$0xf] %vm1323_vm0, %v1673_v27  ;;  %v1029_v32 = vmax.f32 %v853_v28, 0.0  ;;  %v1061_v33 = vmax.f32 %v981_v29, 0.0 }
 0x19c   : > { %v855_v34 = vpop.f32.mrf.mxu0  ;;  %v983_v35 = vpop.f32.mrf.mxu1 }
 0x19d   : > { %v1642_v36 = vpack.c.bf16 %v1029_v32, %v1029_v32  ;;  %v1674_v37 = vpack.c.bf16 %v1061_v33, %v1061_v33  ;;  %v856_v38 = vadd.f32 %v2187_v17, %v855_v34  ;;  %v984_v39 = vadd.f32 %v2187_v17, %v983_v35 }
 0x19e   : > { %v857_v40 = vpop.f32.mrf.mxu0  ;;  %v985_v41 = vpop.f32.mrf.mxu1 }
 0x19f   : > { %1350 = vst.msk [vmem:[%s2194_s28 + $0x68] sm:$0xf] %vm1323_vm0, %v1642_v36  ;;  %1382 = vst.msk [vmem:[%s2194_s28 + $0xe8] sm:$0xf] %vm1323_vm0, %v1674_v37  ;;  %v1030_v42 = vmax.f32 %v856_v38, 0.0  ;;  %v1062_v43 = vmax.f32 %v984_v39, 0.0 }
 0x1a0   : > { %v860_v44 = vpop.f32.mrf.mxu0  ;;  %v988_v45 = vpop.f32.mrf.mxu1 }
 0x1a1   : > { %v1643_v46 = vpack.c.bf16 %v1030_v42, %v1030_v42  ;;  %v1675_v47 = vpack.c.bf16 %v1062_v43, %v1062_v43  ;;  %v861_v48 = vadd.f32 %v2187_v17, %v860_v44  ;;  %v989_v49 = vadd.f32 %v2187_v17, %v988_v45 }
 0x1a2   : > { %v862_v50 = vpop.f32.mrf.mxu0  ;;  %v990_v51 = vpop.f32.mrf.mxu1 }
 0x1a3   : > { %1351 = vst.msk [vmem:[%s2194_s28 + $0x6c] sm:$0xf] %vm1323_vm0, %v1643_v46  ;;  %1383 = vst.msk [vmem:[%s2194_s28 + $0xec] sm:$0xf] %vm1323_vm0, %v1675_v47  ;;  %v1031_v52 = vmax.f32 %v861_v48, 0.0  ;;  %v1063_v53 = vmax.f32 %v989_v49, 0.0 }
 0x1a4   : > { %v863_v54 = vpop.f32.mrf.mxu0  ;;  %v991_v55 = vpop.f32.mrf.mxu1 }
 0x1a5   : > { %v1644_v56 = vpack.c.bf16 %v1031_v52, %v1031_v52  ;;  %v1676_v57 = vpack.c.bf16 %v1063_v53, %v1063_v53  ;;  %v864_v58 = vadd.f32 %v2187_v17, %v863_v54  ;;  %v992_v59 = vadd.f32 %v2187_v17, %v991_v55 }
 0x1a6   : > { %v865_v60 = vpop.f32.mrf.mxu0  ;;  %v993_v61 = vpop.f32.mrf.mxu1 }
 0x1a7   : > { %1352 = vst.msk [vmem:[%s2194_s28 + $0x70] sm:$0xf] %vm1323_vm0, %v1644_v56  ;;  %1384 = vst.msk [vmem:[%s2194_s28 + $0xf0] sm:$0xf] %vm1323_vm0, %v1676_v57  ;;  %v1032_v62 = vmax.f32 %v864_v58, 0.0  ;;  %v1064_v63 = vmax.f32 %v992_v59, 0.0 }
 0x1a8   : > { %v868_v0 = vpop.f32.mrf.mxu0  ;;  %v996_v1 = vpop.f32.mrf.mxu1 }
 0x1a9   : > { %v1645_v2 = vpack.c.bf16 %v1032_v62, %v1032_v62  ;;  %v1677_v3 = vpack.c.bf16 %v1064_v63, %v1064_v63  ;;  %v869_v4 = vadd.f32 %v2187_v17, %v868_v0  ;;  %v997_v5 = vadd.f32 %v2187_v17, %v996_v1 }
 0x1aa   : > { %v870_v6 = vpop.f32.mrf.mxu0  ;;  %v998_v7 = vpop.f32.mrf.mxu1 }
 0x1ab   : > { %1353 = vst.msk [vmem:[%s2194_s28 + $0x74] sm:$0xf] %vm1323_vm0, %v1645_v2  ;;  %1385 = vst.msk [vmem:[%s2194_s28 + $0xf4] sm:$0xf] %vm1323_vm0, %v1677_v3  ;;  %v1033_v8 = vmax.f32 %v869_v4, 0.0  ;;  %v1065_v9 = vmax.f32 %v997_v5, 0.0 }
 0x1ac   : > { %v871_v10 = vpop.f32.mrf.mxu0  ;;  %v999_v11 = vpop.f32.mrf.mxu1 }
 0x1ad   : > { %v1646_v12 = vpack.c.bf16 %v1033_v8, %v1033_v8  ;;  %v1678_v13 = vpack.c.bf16 %v1065_v9, %v1065_v9  ;;  %v872_v14 = vadd.f32 %v2187_v17, %v871_v10  ;;  %v1000_v15 = vadd.f32 %v2187_v17, %v999_v11 }
 0x1ae   : > { %v873_v16 = vpop.f32.mrf.mxu0  ;;  %v1001_v18 = vpop.f32.mrf.mxu1 }
 0x1af   : > { %1354 = vst.msk [vmem:[%s2194_s28 + $0x78] sm:$0xf] %vm1323_vm0, %v1646_v12  ;;  %1386 = vst.msk [vmem:[%s2194_s28 + $0xf8] sm:$0xf] %vm1323_vm0, %v1678_v13  ;;  %v1034_v19 = vmax.f32 %v872_v14, 0.0  ;;  %v1066_v20 = vmax.f32 %v1000_v15, 0.0 }
 0x1b1   : > { %v1647_v21 = vpack.c.bf16 %v1034_v19, %v1034_v19  ;;  %v1679_v22 = vpack.c.bf16 %v1066_v20, %v1066_v20 }
 0x1b3   : > { %1355 = vst.msk [vmem:[%s2194_s28 + $0x7c] sm:$0xf] %vm1323_vm0, %v1647_v21  ;;  %1387 = vst.msk [vmem:[%s2194_s28 + $0xfc] sm:$0xf] %vm1323_vm0, %v1679_v22 }
 0x1b4 PF: > { %p13_p9 = scmp.ge.s32.totalorder %s1974_s17, 6   ;;  %s2408_s12 = smov %s1920_s13 }
 0x1b5   : > { %s2409_s13 = smov %s1924_s14  ;;  %s2410_s14 = smov %s1984_s20 }
 0x1b6   : > { %s2411_s15 = smov %s1974_s17  ;;  %15 = sbr.rel (!%p13_p9) target bundleno = 3 (0x3), region = 72 }
 0x1bb   :  { %1410 = vsyncpa [#allocation3], 1 }
 0x1bc   :  { %1412 = vsyncpa [#allocation3 + $0x1], 1 }

</bundles_post_ra>
